<compile_context>
chip_gen: v5e
topology: v5e:2x2
jax: 0.10.0
libtpu: 0.0.40
codegen_flags: <defaults>
</compile_context>

<pallas_src>
from functools import partial

import jax
import jax.numpy as jnp
from jax import lax
from jax.experimental import pallas as pl
from jax.experimental.pallas import tpu as pltpu


def _round_up(x, m):
    return (x + m - 1) // m * m


def capsule_kernel(x_ref, won_ref, wno_ref, o_ref, *, iterations, n_caps):
    """Dynamic routing for one batch tile.

    x_ref  : (P, TB, O)  raw input tile (p b o layout, batch on sublanes)
    won_ref: (O, N)      w_sum.T (shared across the whole batch)
    wno_ref: (N, O)      w_sum
    o_ref  : (TB, O)     squashed capsule output (batch-major)
    """
    f32 = jnp.float32

    # Fused P-reduction (in f32) + transpose to lane-dense (feature, batch).
    x_sum = jnp.sum(x_ref[...].astype(f32), axis=0)          # (TB, O)
    xs = jnp.transpose(x_sum)                                 # (O, TB)  XLU
    w_on = won_ref[...].astype(f32)                           # (O, N)
    w_no = wno_ref[...].astype(f32)                           # (N, O)

    tb = xs.shape[1]
    xs2 = xs * xs                                             # hoisted out of loop
    # Contract the shared N / O axis; the batch tile stays on the lane axis.
    dn = (((1,), (0,)), ((), ()))

    # softmax(zeros) over N is uniform 1/N.
    coeffs = jnp.full((n_caps, tb), 1.0 / n_caps, dtype=f32)
    logits = jnp.zeros((n_caps, tb), dtype=f32)

    for _ in range(iterations - 1):       # static unroll, iterations is small
        # coeffs @ xp  ==  (w_sum.T @ coeffs) * x_sum   (xs factor folded below)
        cw = lax.dot_general(w_on, coeffs, dn, preferred_element_type=f32)  # (O, TB)
        t = cw * xs2                                          # cw * xs^2
        # squash over O (sublane axis): sumsq = sum_o (cw*xs)^2 = sum_o cw*t
        sumsq = jnp.sum(cw * t, axis=0, keepdims=True)        # (1, TB)
        scale = jnp.sqrt(sumsq) / (1.0 + sumsq)
        # routed @ xp.mT == w_sum @ (routed * xs) == w_sum @ (scale * t)
        delta = lax.dot_general(w_no, scale * t, dn,
                                preferred_element_type=f32)   # (N, TB)
        logits = logits + delta
        m = jnp.max(logits, axis=0, keepdims=True)
        e = jnp.exp(logits - m)
        coeffs = e / jnp.sum(e, axis=0, keepdims=True)        # exact softmax

    # Final squash(coeffs @ xp).
    cw = lax.dot_general(w_on, coeffs, dn, preferred_element_type=f32)       # (O, TB)
    v = cw * xs
    sumsq = jnp.sum(v * v, axis=0, keepdims=True)
    scale = jnp.sqrt(sumsq) / (1.0 + sumsq)
    out = scale * v                                                          # (O, TB)
    o_ref[...] = jnp.transpose(out).astype(o_ref.dtype)                      # (TB, O)


def capsule_forward(x_pbo, caps_weights, iterations, *, batch_tile=4096):
    """x_pbo: (P, B, O) as in the PyTorch module; returns (B, 1, O)."""
    P, B, O = x_pbo.shape
    N, C, O2 = caps_weights.shape
    assert O == O2, "input last dim must equal output_dim"
    out_dtype = jnp.promote_types(x_pbo.dtype, caps_weights.dtype)

    # Pre-reduce the summed-out C axis of the weights in f32 (tiny: N x O).
    w_no = jnp.sum(caps_weights.astype(jnp.float32), axis=1)     # (N, O)
    w_on = w_no.T                                                 # (O, N)

    # Batch tile: multiple of 128 (batch rides the lane axis in-kernel),
    # capped by batch_tile, and capped again so the grid has >= 2 steps when
    # B allows it (engages both TensorCores on v7x).  No batch padding: the
    # last grid step is a partial block handled by Pallas.
    tb = min(batch_tile, _round_up(B, 128))
    if B > 128:
        tb = min(tb, _round_up(pl.cdiv(B, 2), 128))
    tb = max(128, tb)
    n_tiles = pl.cdiv(B, tb)

    # Rough VMEM footprint: double-buffered (P, tb, O) input + (tb, O) output
    # blocks plus a handful of (O, tb) f32 intermediates.  Keep batch_tile
    # moderate (<= ~4096) on v5e; explicit limit so big tiles don't silently
    # exceed the 16/32 MiB scoped defaults.
    x_isz = jnp.dtype(x_pbo.dtype).itemsize
    o_isz = jnp.dtype(out_dtype).itemsize
    est = 2 * P * tb * O * x_isz + 2 * tb * O * o_isz
    est += 12 * tb * max(O, 8) * 4 + (1 << 20)
    vmem_limit = int(max(est, 32 << 20))

    kernel = partial(capsule_kernel, iterations=iterations, n_caps=N)
    out = pl.pallas_call(
        kernel,
        out_shape=jax.ShapeDtypeStruct((B, O), out_dtype),
        grid_spec=pltpu.PrefetchScalarGridSpec(
            num_scalar_prefetch=0,
            grid=(n_tiles,),
            in_specs=[
                pl.BlockSpec((P, tb, O), lambda b: (0, b, 0)),   # raw x batch tile
                pl.BlockSpec((O, N), lambda b: (0, 0)),          # w_sum.T (whole)
                pl.BlockSpec((N, O), lambda b: (0, 0)),          # w_sum   (whole)
            ],
            out_specs=pl.BlockSpec((tb, O), lambda b: (b, 0)),
        ),
        compiler_params=pltpu.CompilerParams(
            dimension_semantics=("parallel",),   # batch tiles are independent
            vmem_limit_bytes=vmem_limit),
    )(x_pbo, w_on, w_no)

    return out.reshape(B, 1, O)


def _squash_ref(x):
    norm = jnp.sqrt(jnp.sum(x * x, axis=-1, keepdims=True))
    return (norm / (1.0 + norm * norm)) * x


def capsule_reference(x_pbo, caps_weights, iterations):
    """Pure-JAX reference mirroring the PyTorch forward (detach has no fwd effect)."""
    xp = jnp.einsum('nco,pbo->bno', caps_weights, x_pbo)           # (B, N, O)
    B, N, _ = xp.shape
    logits = jnp.zeros((B, 1, N), dtype=xp.dtype)
    coeffs = jax.nn.softmax(logits, axis=-1)
    for _ in range(iterations - 1):
        routed = _squash_ref(coeffs @ xp)                           # (B, 1, O)
        logits = logits + routed @ jnp.swapaxes(xp, -1, -2)         # (B, 1, N)
        coeffs = jax.nn.softmax(logits, axis=-1)
    return _squash_ref(coeffs @ xp)                                 # (B, 1, O)


if __name__ == "__main__":
    # Small synthetic config consistent with the module's __init__/forward.
    n_caps, caps_dim, output_dim, iterations = 8, 16, 32, 3
    P, B = 4, 2   # x is 'p b o'

    key = jax.random.PRNGKey(0)
    kw, kx = jax.random.split(key)
    caps_weights = 0.01 * jax.random.normal(
        kw, (n_caps, caps_dim, output_dim), dtype=jnp.float32)
    x = jax.random.normal(kx, (P, B, output_dim), dtype=jnp.float32)

    out = capsule_forward(x, caps_weights, iterations)
    out = jax.block_until_ready(out)

    ref = capsule_reference(x, caps_weights, iterations)
    assert out.shape == (B, 1, output_dim)
    assert jnp.allclose(out, ref, atol=1e-5, rtol=1e-3), (
        f"max abs err {jnp.max(jnp.abs(out - ref))}")

    print("KERNEL_OK")
</pallas_src>

<mosaic_0001>
module attributes {stable_mosaic.version = 11 : i64} {
  func.func @capsule_kernel(%arg0: i32, %arg1: memref<4x128x32xf32, #tpu.memory_space<vmem>>, %arg2: memref<32x8xf32, #tpu.memory_space<vmem>>, %arg3: memref<8x32xf32, #tpu.memory_space<vmem>>, %arg4: memref<128x32xf32, #tpu.memory_space<vmem>>) attributes {dimension_semantics = [#tpu.dimension_semantics<parallel>], iteration_bounds = array<i64: 1>, scalar_prefetch = 0 : i64, scratch_operands = 0 : i64, tpu.core_type = #tpu.core_type<tc>, window_params = [{transform_indices = @transform_0, window_bounds = array<i64: 4, 128, 32>}, {pipeline_mode = #tpu.pipeline_mode<synchronous>, transform_indices = @transform_1, window_bounds = array<i64: 32, 8>}, {pipeline_mode = #tpu.pipeline_mode<synchronous>, transform_indices = @transform_2, window_bounds = array<i64: 8, 32>}, {transform_indices = @transform_3, window_bounds = array<i64: 128, 32>}]} {
    %c0 = arith.constant 0 : index
    %c0_0 = arith.constant 0 : index
    %c0_1 = arith.constant 0 : index
    %0 = vector.load %arg1[%c0, %c0_0, %c0_1] : memref<4x128x32xf32, #tpu.memory_space<vmem>>, vector<4x128x32xf32>
    %cst = arith.constant dense<0.000000e+00> : vector<128x32xf32>
    %1 = vector.multi_reduction <add>, %0, %cst [0] : vector<4x128x32xf32> to vector<128x32xf32>
    %2 = tpu.transpose %1, [1, 0] : vector<128x32xf32> -> vector<32x128xf32>
    %c0_2 = arith.constant 0 : index
    %c0_3 = arith.constant 0 : index
    %3 = vector.load %arg2[%c0_2, %c0_3] : memref<32x8xf32, #tpu.memory_space<vmem>>, vector<32x8xf32>
    %c0_4 = arith.constant 0 : index
    %c0_5 = arith.constant 0 : index
    %4 = vector.load %arg3[%c0_4, %c0_5] : memref<8x32xf32, #tpu.memory_space<vmem>>, vector<8x32xf32>
    %5 = arith.mulf %2, %2 : vector<32x128xf32>
    %cst_6 = arith.constant 1.250000e-01 : f32
    %6 = vector.broadcast %cst_6 : f32 to vector<8x128xf32>
    %cst_7 = arith.constant 0.000000e+00 : f32
    %7 = vector.broadcast %cst_7 : f32 to vector<8x128xf32>
    %cst_8 = arith.constant dense<0.000000e+00> : vector<32x128xf32>
    %8 = tpu.matmul %3, %6, %cst_8 {dimension_numbers = #tpu.dot_dimension_numbers<[1], [0], [0], [1], [0, 0, 1, 1], [], []>} : vector<32x8xf32>, vector<8x128xf32>, vector<32x128xf32> -> vector<32x128xf32>
    %9 = arith.mulf %8, %5 : vector<32x128xf32>
    %10 = arith.mulf %8, %9 : vector<32x128xf32>
    %cst_9 = arith.constant dense<0.000000e+00> : vector<128xf32>
    %11 = vector.multi_reduction <add>, %10, %cst_9 [0] : vector<32x128xf32> to vector<128xf32>
    %12 = vector.shape_cast %11 : vector<128xf32> to vector<1x128xf32>
    %13 = math.sqrt %12 : vector<1x128xf32>
    %cst_10 = arith.constant 1.000000e+00 : f32
    %14 = vector.broadcast %cst_10 : f32 to vector<1x128xf32>
    %15 = arith.addf %14, %12 : vector<1x128xf32>
    %16 = arith.divf %13, %15 : vector<1x128xf32>
    %17 = vector.broadcast %16 : vector<1x128xf32> to vector<32x128xf32>
    %18 = arith.mulf %17, %9 : vector<32x128xf32>
    %cst_11 = arith.constant dense<0.000000e+00> : vector<8x128xf32>
    %19 = tpu.matmul %4, %18, %cst_11 {dimension_numbers = #tpu.dot_dimension_numbers<[1], [0], [0], [1], [0, 0, 1, 1], [], []>} : vector<8x32xf32>, vector<32x128xf32>, vector<8x128xf32> -> vector<8x128xf32>
    %20 = arith.addf %7, %19 : vector<8x128xf32>
    %cst_12 = arith.constant dense<0xFF800000> : vector<128xf32>
    %21 = vector.multi_reduction <maximumf>, %20, %cst_12 [0] : vector<8x128xf32> to vector<128xf32>
    %22 = vector.shape_cast %21 : vector<128xf32> to vector<1x128xf32>
    %23 = vector.broadcast %22 : vector<1x128xf32> to vector<8x128xf32>
    %24 = arith.subf %20, %23 : vector<8x128xf32>
    %25 = math.exp %24 : vector<8x128xf32>
    %cst_13 = arith.constant dense<0.000000e+00> : vector<128xf32>
    %26 = vector.multi_reduction <add>, %25, %cst_13 [0] : vector<8x128xf32> to vector<128xf32>
    %27 = vector.shape_cast %26 : vector<128xf32> to vector<1x128xf32>
    %28 = vector.broadcast %27 : vector<1x128xf32> to vector<8x128xf32>
    %29 = arith.divf %25, %28 : vector<8x128xf32>
    %cst_14 = arith.constant dense<0.000000e+00> : vector<32x128xf32>
    %30 = tpu.matmul %3, %29, %cst_14 {dimension_numbers = #tpu.dot_dimension_numbers<[1], [0], [0], [1], [0, 0, 1, 1], [], []>} : vector<32x8xf32>, vector<8x128xf32>, vector<32x128xf32> -> vector<32x128xf32>
    %31 = arith.mulf %30, %5 : vector<32x128xf32>
    %32 = arith.mulf %30, %31 : vector<32x128xf32>
    %cst_15 = arith.constant dense<0.000000e+00> : vector<128xf32>
    %33 = vector.multi_reduction <add>, %32, %cst_15 [0] : vector<32x128xf32> to vector<128xf32>
    %34 = vector.shape_cast %33 : vector<128xf32> to vector<1x128xf32>
    %35 = math.sqrt %34 : vector<1x128xf32>
    %cst_16 = arith.constant 1.000000e+00 : f32
    %36 = vector.broadcast %cst_16 : f32 to vector<1x128xf32>
    %37 = arith.addf %36, %34 : vector<1x128xf32>
    %38 = arith.divf %35, %37 : vector<1x128xf32>
    %39 = vector.broadcast %38 : vector<1x128xf32> to vector<32x128xf32>
    %40 = arith.mulf %39, %31 : vector<32x128xf32>
    %cst_17 = arith.constant dense<0.000000e+00> : vector<8x128xf32>
    %41 = tpu.matmul %4, %40, %cst_17 {dimension_numbers = #tpu.dot_dimension_numbers<[1], [0], [0], [1], [0, 0, 1, 1], [], []>} : vector<8x32xf32>, vector<32x128xf32>, vector<8x128xf32> -> vector<8x128xf32>
    %42 = arith.addf %20, %41 : vector<8x128xf32>
    %cst_18 = arith.constant dense<0xFF800000> : vector<128xf32>
    %43 = vector.multi_reduction <maximumf>, %42, %cst_18 [0] : vector<8x128xf32> to vector<128xf32>
    %44 = vector.shape_cast %43 : vector<128xf32> to vector<1x128xf32>
    %45 = vector.broadcast %44 : vector<1x128xf32> to vector<8x128xf32>
    %46 = arith.subf %42, %45 : vector<8x128xf32>
    %47 = math.exp %46 : vector<8x128xf32>
    %cst_19 = arith.constant dense<0.000000e+00> : vector<128xf32>
    %48 = vector.multi_reduction <add>, %47, %cst_19 [0] : vector<8x128xf32> to vector<128xf32>
    %49 = vector.shape_cast %48 : vector<128xf32> to vector<1x128xf32>
    %50 = vector.broadcast %49 : vector<1x128xf32> to vector<8x128xf32>
    %51 = arith.divf %47, %50 : vector<8x128xf32>
    %cst_20 = arith.constant dense<0.000000e+00> : vector<32x128xf32>
    %52 = tpu.matmul %3, %51, %cst_20 {dimension_numbers = #tpu.dot_dimension_numbers<[1], [0], [0], [1], [0, 0, 1, 1], [], []>} : vector<32x8xf32>, vector<8x128xf32>, vector<32x128xf32> -> vector<32x128xf32>
    %53 = arith.mulf %52, %2 : vector<32x128xf32>
    %54 = arith.mulf %53, %53 : vector<32x128xf32>
    %cst_21 = arith.constant dense<0.000000e+00> : vector<128xf32>
    %55 = vector.multi_reduction <add>, %54, %cst_21 [0] : vector<32x128xf32> to vector<128xf32>
    %56 = vector.shape_cast %55 : vector<128xf32> to vector<1x128xf32>
    %57 = math.sqrt %56 : vector<1x128xf32>
    %cst_22 = arith.constant 1.000000e+00 : f32
    %58 = vector.broadcast %cst_22 : f32 to vector<1x128xf32>
    %59 = arith.addf %58, %56 : vector<1x128xf32>
    %60 = arith.divf %57, %59 : vector<1x128xf32>
    %61 = vector.broadcast %60 : vector<1x128xf32> to vector<32x128xf32>
    %62 = arith.mulf %61, %53 : vector<32x128xf32>
    %63 = tpu.transpose %62, [1, 0] : vector<32x128xf32> -> vector<128x32xf32>
    %c0_23 = arith.constant 0 : index
    %c0_24 = arith.constant 0 : index
    %64 = vector.load %arg4[%c0_23, %c0_24] : memref<128x32xf32, #tpu.memory_space<vmem>>, vector<128x32xf32>
    tpu.vector_store %arg4[%c0_23, %c0_24], %63 {strides = array<i32>} : memref<128x32xf32, #tpu.memory_space<vmem>>, vector<128x32xf32>,
    return
  }
  func.func @transform_0(%arg0: i32) -> (i32, i32, i32) {
    %c0_i32 = arith.constant 0 : i32
    %c0_i32_0 = arith.constant 0 : i32
    %c0_i32_1 = arith.constant 0 : i32
    return %c0_i32, %arg0, %c0_i32_0 : i32, i32, i32
  }
  func.func @transform_1(%arg0: i32) -> (i32, i32) {
    %c0_i32 = arith.constant 0 : i32
    %c0_i32_0 = arith.constant 0 : i32
    %c0_i32_1 = arith.constant 0 : i32
    return %c0_i32, %c0_i32_0 : i32, i32
  }
  func.func @transform_2(%arg0: i32) -> (i32, i32) {
    %c0_i32 = arith.constant 0 : i32
    %c0_i32_0 = arith.constant 0 : i32
    %c0_i32_1 = arith.constant 0 : i32
    return %c0_i32, %c0_i32_0 : i32, i32
  }
  func.func @transform_3(%arg0: i32) -> (i32, i32) {
    %c0_i32 = arith.constant 0 : i32
    %c0_i32_0 = arith.constant 0 : i32
    return %arg0, %c0_i32 : i32, i32
  }
}

</mosaic_0001>

<bundles_post_ra>
// kernel: tpu_custom_call.1
= control target key start
LH: loop header
LB: loop body
LE: loop exit
PB: predicated region body
PF: predicated region fallthrough
CT: control target
= control target key end

     0   :  { %vm134_vm0 = vcmask 261120   ;;  %s988_s0 = inlined_call_operand.vmem [shape: f32[4,2,32], index: 0, kind: input, shape index: {}]   ;;  %s989_s1 = inlined_call_operand.vmem [shape: f32[32,8], index: 1, kind: input, shape index: {}]   ;;  %s990_s2 = inlined_call_operand.vmem [shape: f32[8,32], index: 2, kind: input, shape index: {}]   ;;  %s991_s3 = inlined_call_operand.hbm [shape: f32[2,32], index: 3, kind: output, shape index: {}]  }
   0x1   :  { %v27_v0 = vld [vmem:[%s988_s0] sm:$0x3]  ;;  %v29_v1 = vld [vmem:[%s988_s0 + $0x2] sm:$0x3]  ;;  %v31_v2 = vld [vmem:[%s988_s0 + $0x4] sm:$0x3] }
   0x2   :  { %28 = vst [vmem:[#allocation2 + $0xa0] sm:$0x3] %v27_v0  ;;  %v33_v3 = vld [vmem:[%s988_s0 + $0x6] sm:$0x3] }
   0x3   :  { %30 = vst [vmem:[#allocation2 + $0x1b0] sm:$0x3] %v29_v1 }
   0x4   :  { %32 = vst [vmem:[#allocation2 + $0xc8] sm:$0x3] %v31_v2 }
   0x5   :  { %34 = vst [vmem:[#allocation2 + $0x180] sm:$0x3] %v33_v3 }
   0x6   :  { %8 = vsyncpa [#allocation4], 0  ;;  %v71_v4 = vld [vmem:[#allocation2 + $0x38] sm:$0xff]  ;;  %v103_v16 = vld [vmem:[#allocation2 + $0xf0] sm:$0xff]  ;;  %v774_v29 = vmov 0.125   ;;  %vm288_vm1 = vcmask 64512  }
   0x7   :  { %v87_v5 = vld [vmem:[#allocation2 + $0x138] sm:$0xff]  ;;  %v142_v11 = vsel %vm134_vm0, %v71_v4, 0.0  ;;  %v145_v20 = vsel %vm134_vm0, %v103_v16, 0.0  ;;  %v119_v22 = vld [vmem:[#allocation2 + $0x70] sm:$0xff]  ;;  %v72_v23 = vld [vmem:[#allocation2 + $0x160] sm:$0xff]  ;;  %316 = vmatpush.msra.mxu0 %v774_v29 }
   0x8   :  { %v143_v12 = vsel %vm134_vm0, %v87_v5, 0.0  ;;  %v88_v24 = vld [vmem:[#allocation2 + $0x68] sm:$0xff]  ;;  %v147_v26 = vsel %vm134_vm0, %v119_v22, 0.0  ;;  %v149_v27 = vsel %vm134_vm0, %v72_v23, 0.0  ;;  %v104_v30 = vld [vmem:[#allocation2 + $0xb8] sm:$0xff]  ;;  %v824_v38 = vld [vmem:[%s989_s1] sm:$0xff] }
   0x9   :  { %v70_v6 = vld [vmem:[#allocation2 + $0xa0] sm:$0xff]  ;;  %v144_v19 = vadd.f32 %v143_v12, %v142_v11  ;;  %v150_v28 = vsel %vm134_vm0, %v88_v24, 0.0  ;;  %v152_v33 = vsel %vm134_vm0, %v104_v30, 0.0  ;;  %v120_v34 = vld [vmem:[#allocation2 + $0x98] sm:$0xff]  ;;  %v73_v35 = vld [vmem:[#allocation2 + $0x128] sm:$0xff]  ;;  %709 = vmatmul.msk.f32.vlgmr.msra.gmra.mxu0 %vm288_vm1, %v824_v38 }
   0xa   :  { %v86_v7 = vld [vmem:[#allocation2 + $0x1b0] sm:$0xff]  ;;  %v135_v8 = vsel %vm134_vm0, %v70_v6, 0.0  ;;  %v151_v32 = vadd.f32 %v150_v28, %v149_v27  ;;  %v89_v36 = vld [vmem:[#allocation2 + $0x1a8] sm:$0xff]  ;;  %v154_v39 = vsel %vm134_vm0, %v120_v34, 0.0  ;;  %v156_v40 = vsel %vm134_vm0, %v73_v35, 0.0  ;;  %v90_v48 = vld [vmem:[#allocation2 + $0x1b8] sm:$0xff] }
   0xb   :  { %v102_v9 = vld [vmem:[#allocation2 + $0xc8] sm:$0xff]  ;;  %v136_v10 = vsel %vm134_vm0, %v86_v7, 0.0  ;;  %v146_v25 = vadd.f32 %v145_v20, %v144_v19  ;;  %v157_v41 = vsel %vm134_vm0, %v89_v36, 0.0  ;;  %v74_v47 = vld [vmem:[#allocation2 + $0x30] sm:$0xff]  ;;  %v164_v53 = vsel %vm134_vm0, %v90_v48, 0.0  ;;  %v106_v54 = vld [vmem:[#allocation2 + $0x1f8] sm:$0xff] }
   0xc   :  { %v118_v13 = vld [vmem:[#allocation2 + $0x180] sm:$0xff]  ;;  %v137_v14 = vadd.f32 %v136_v10, %v135_v8  ;;  %v138_v15 = vsel %vm134_vm0, %v102_v9, 0.0  ;;  %v153_v37 = vadd.f32 %v152_v33, %v151_v32  ;;  %v105_v42 = vld [vmem:[#allocation2 + $0x28] sm:$0xff]  ;;  %v158_v44 = vadd.f32 %v157_v41, %v156_v40  ;;  %v75_v59 = vld [vmem:[#allocation2 + $0x178] sm:$0xff] }
   0xd   :  { %v140_v17 = vsel %vm134_vm0, %v118_v13, 0.0  ;;  %v148_v31 = vadd.f32 %v147_v26, %v146_v25  ;;  %v159_v45 = vsel %vm134_vm0, %v105_v42, 0.0  ;;  %v121_v46 = vld [vmem:[#allocation2 + $0x1c8] sm:$0xff]  ;;  %v163_v52 = vsel %vm134_vm0, %v74_v47, 0.0  ;;  %v91_v60 = vld [vmem:[#allocation2 + $0x10] sm:$0xff]  ;;  %v857_v10 = vld [vmem:[%s989_s1 + $0x18] sm:$0xff] }
   0xe   :  { %v139_v18 = vadd.f32 %v138_v15, %v137_v14  ;;  %v155_v43 = vadd.f32 %v154_v39, %v153_v37  ;;  %v160_v49 = vadd.f32 %v159_v45, %v158_v44  ;;  %v835_v50 = vld [vmem:[%s989_s1 + $0x8] sm:$0xff]  ;;  %v161_v51 = vsel %vm134_vm0, %v121_v46, 0.0  ;;  %v846_v62 = vld [vmem:[%s989_s1 + $0x10] sm:$0xff]  ;;  %v108_v14 = vld [vmem:[#allocation2 + $0x120] sm:$0xff] }
   0xf   :  { %v165_v56 = vadd.f32 %v164_v53, %v163_v52  ;;  %v166_v57 = vsel %vm134_vm0, %v106_v54, 0.0  ;;  %v122_v58 = vld [vmem:[#allocation2 + $0x168] sm:$0xff]  ;;  %v170_v0 = vsel %vm134_vm0, %v75_v59, 0.0  ;;  %v171_v1 = vsel %vm134_vm0, %v91_v60, 0.0  ;;  %v123_v6 = vld [vmem:[#allocation2 + $0x170] sm:$0xff]  ;;  %v109_v25 = vld [vmem:[#allocation2 + $0x1a0] sm:$0xff] }
  0x10   :  { %v141_v21 = vadd.f32 %v140_v17, %v139_v18  ;;  %v162_v55 = vadd.f32 %v161_v51, %v160_v49  ;;  %v168_v63 = vsel %vm134_vm0, %v122_v58, 0.0  ;;  %v107_v2 = vld [vmem:[#allocation2 + $0x8] sm:$0xff]  ;;  %v172_v4 = vadd.f32 %v171_v1, %v170_v0  ;;  %v124_v18 = vld [vmem:[#allocation2 + $0x50] sm:$0xff]  ;;  %v126_v41 = vld [vmem:[#allocation2 + $0x198] sm:$0xff] }
  0x11   :  { %710 = vmatmul.msk.f32.gmra.mxu0 %vm288_vm1, %v835_v50  ;;  %v167_v61 = vadd.f32 %v166_v57, %v165_v56  ;;  %v173_v5 = vsel %vm134_vm0, %v107_v2, 0.0  ;;  %v76_v7 = vld [vmem:[#allocation2 + $0x108] sm:$0xff]  ;;  %v175_v11 = vsel %vm134_vm0, %v123_v6, 0.0  ;;  %v180_v17 = vsel %vm134_vm0, %v108_v14, 0.0  ;;  %v77_v19 = vld [vmem:[#allocation2 + $0x110] sm:$0xff]  ;;  %v79_v42 = vld [vmem:[#allocation2 + $0x118] sm:$0xff] }
  0x12   :  { %247 = vxpose.xlu0.b32.start [1/16] (narrow) %v141_v21, 32  ;;  %v92_v8 = vld [vmem:[#allocation2 + $0x1e8] sm:$0xff]  ;;  %v174_v9 = vadd.f32 %v173_v5, %v172_v4  ;;  %v177_v12 = vsel %vm134_vm0, %v76_v7, 0.0  ;;  %v182_v22 = vsel %vm134_vm0, %v124_v18, 0.0  ;;  %v184_v23 = vsel %vm134_vm0, %v77_v19, 0.0  ;;  %v125_v29 = vld [vmem:[#allocation2 + $0x190] sm:$0xff] }
  0x13   :  { %v169_v3 = vadd.f32 %v168_v63, %v167_v61  ;;  %v178_v13 = vsel %vm134_vm0, %v92_v8, 0.0  ;;  %v93_v20 = vld [vmem:[#allocation2 + $0xe8] sm:$0xff]  ;;  %v187_v28 = vsel %vm134_vm0, %v109_v25, 0.0  ;;  %v189_v33 = vsel %vm134_vm0, %v125_v29, 0.0  ;;  %v110_v36 = vld [vmem:[#allocation2 + $0x1f0] sm:$0xff]  ;;  %v111_v48 = vld [vmem:[#allocation2 + $0xd8] sm:$0xff] }
  0x14   :  { %v176_v15 = vadd.f32 %v175_v11, %v174_v9  ;;  %v179_v16 = vadd.f32 %v178_v13, %v177_v12  ;;  %v185_v24 = vsel %vm134_vm0, %v93_v20, 0.0  ;;  %v78_v30 = vld [vmem:[#allocation2 + $0x88] sm:$0xff]  ;;  %v194_v40 = vsel %vm134_vm0, %v110_v36, 0.0  ;;  %v127_v53 = vld [vmem:[#allocation2 + $0x20] sm:$0xff]  ;;  %v128_v1 = vld [vmem:[#allocation2 + $0xb0] sm:$0xff] }
  0x15   :  { %v186_v27 = vadd.f32 %v185_v24, %v184_v23  ;;  %v191_v34 = vsel %vm134_vm0, %v78_v30, 0.0  ;;  %v196_v45 = vsel %vm134_vm0, %v126_v41, 0.0  ;;  %v198_v46 = vsel %vm134_vm0, %v79_v42, 0.0  ;;  %v80_v54 = vld [vmem:[#allocation2 + $0x148] sm:$0xff]  ;;  %v112_v60 = vld [vmem:[#allocation2 + $0x60] sm:$0xff]  ;;  %v81_v2 = vld [vmem:[#allocation2 + $0xf8] sm:$0xff] }
  0x16   :  { %v181_v21 = vadd.f32 %v180_v17, %v179_v16  ;;  %v201_v52 = vsel %vm134_vm0, %v111_v48, 0.0  ;;  %v203_v57 = vsel %vm134_vm0, %v127_v53, 0.0  ;;  %v205_v58 = vsel %vm134_vm0, %v80_v54, 0.0  ;;  %v113_v8 = vld [vmem:[#allocation2 + $0x58] sm:$0xff]  ;;  %v129_v13 = vld [vmem:[#allocation2 + $0x1c0] sm:$0xff]  ;;  %v82_v14 = vld [vmem:[#allocation2 + $0x48] sm:$0xff] }
  0x17   :  { %v188_v32 = vadd.f32 %v187_v28, %v186_v27  ;;  %v208_v0 = vsel %vm134_vm0, %v112_v60, 0.0  ;;  %v210_v5 = vsel %vm134_vm0, %v128_v1, 0.0  ;;  %v212_v6 = vsel %vm134_vm0, %v81_v2, 0.0  ;;  %v114_v20 = vld [vmem:[#allocation2 + $0x78] sm:$0xff]  ;;  %v130_v24 = vld [vmem:[#allocation2 + $0x150] sm:$0xff]  ;;  %v84_v36 = vld [vmem:[#allocation2 + $0x188] sm:$0xff] }
  0x18   :  { %v183_v26 = vadd.f32 %v182_v22, %v181_v21  ;;  %v215_v12 = vsel %vm134_vm0, %v113_v8, 0.0  ;;  %v217_v17 = vsel %vm134_vm0, %v129_v13, 0.0  ;;  %v219_v18 = vsel %vm134_vm0, %v82_v14, 0.0  ;;  %v83_v25 = vld [vmem:[#allocation2 + $0xd0] sm:$0xff] }
  0x19   :  { %711 = vmatmul.msk.f32.gmra.mxu0 %vm288_vm1, %v846_v62  ;;  %v190_v37 = vadd.f32 %v189_v33, %v188_v32  ;;  %v222_v23 = vsel %vm134_vm0, %v114_v20, 0.0  ;;  %v224_v28 = vsel %vm134_vm0, %v130_v24, 0.0  ;;  %v226_v29 = vsel %vm134_vm0, %v83_v25, 0.0  ;;  %v85_v48 = vld [vmem:[#allocation2 + $0x130] sm:$0xff] }
  0x1a   :  { %248 = vxpose.xlu0.b32.cont [2/16] (narrow) %v148_v31, 32  ;;  %v94_v31 = vld [vmem:[#allocation2 + $0x158] sm:$0xff]  ;;  %v233_v41 = vsel %vm134_vm0, %v84_v36, 0.0  ;;  %v240_v53 = vsel %vm134_vm0, %v85_v48, 0.0 }
  0x1b   :  { %v192_v35 = vsel %vm134_vm0, %v94_v31, 0.0  ;;  %v115_v31 = vld [vmem:[#allocation2 + $0x1d8] sm:$0xff] }
  0x1c   :  { %v193_v39 = vadd.f32 %v192_v35, %v191_v34  ;;  %v229_v34 = vsel %vm134_vm0, %v115_v31, 0.0  ;;  %v131_v35 = vld [vmem:[#allocation2 + $0x100] sm:$0xff] }
  0x1e   :  { %v195_v44 = vadd.f32 %v194_v40, %v193_v39  ;;  %v231_v40 = vsel %vm134_vm0, %v131_v35, 0.0 }
  0x20   :  { %v197_v49 = vadd.f32 %v196_v45, %v195_v44 }
  0x21   :  { %712 = vmatmul.msk.f32.gmra.mxu0 %vm288_vm1, %v857_v10 }
  0x22   :  { %249 = vxpose.xlu0.b32.cont [3/16] (narrow) %v155_v43, 32  ;;  %v95_v43 = vld [vmem:[#allocation2 + $0x18] sm:$0xff] }
  0x23   :  { %v199_v47 = vsel %vm134_vm0, %v95_v43, 0.0  ;;  %v116_v43 = vld [vmem:[#allocation2 + $0xc0] sm:$0xff] }
  0x24   :  { %v200_v51 = vadd.f32 %v199_v47, %v198_v46  ;;  %v236_v46 = vsel %vm134_vm0, %v116_v43, 0.0  ;;  %v132_v47 = vld [vmem:[#allocation2 + $0x40] sm:$0xff] }
  0x26   :  { %v202_v56 = vadd.f32 %v201_v52, %v200_v51  ;;  %v238_v52 = vsel %vm134_vm0, %v132_v47, 0.0 }
  0x28   :  { %v204_v61 = vadd.f32 %v203_v57, %v202_v56 }
  0x2a   :  { %250 = vxpose.xlu0.b32.cont [4/16] (narrow) %v162_v55, 32  ;;  %v96_v55 = vld [vmem:[#allocation2 + $0x1e0] sm:$0xff] }
  0x2b   :  { %v206_v59 = vsel %vm134_vm0, %v96_v55, 0.0  ;;  %v117_v55 = vld [vmem:[#allocation2 + $0xa8] sm:$0xff] }
  0x2c   :  { %v207_v63 = vadd.f32 %v206_v59, %v205_v58  ;;  %v243_v58 = vsel %vm134_vm0, %v117_v55, 0.0  ;;  %v133_v59 = vld [vmem:[#allocation2 + $0x90] sm:$0xff] }
  0x2e   :  { %v209_v4 = vadd.f32 %v208_v0, %v207_v63 }
  0x30   :  { %v211_v9 = vadd.f32 %v210_v5, %v209_v4 }
  0x32   :  { %251 = vxpose.xlu0.b32.cont [5/16] (narrow) %v169_v3, 32  ;;  %v97_v3 = vld [vmem:[#allocation2] sm:$0xff] }
  0x33   :  { %v213_v7 = vsel %vm134_vm0, %v97_v3, 0.0 }
  0x34   :  { %v214_v11 = vadd.f32 %v213_v7, %v212_v6 }
  0x36   :  { %v216_v16 = vadd.f32 %v215_v12, %v214_v11 }
  0x38   :  { %v218_v21 = vadd.f32 %v217_v17, %v216_v16 }
  0x3a   :  { %252 = vxpose.xlu0.b32.cont [6/16] (narrow) %v176_v15, 32  ;;  %v98_v15 = vld [vmem:[#allocation2 + $0xe0] sm:$0xff] }
  0x3b   :  { %v220_v19 = vsel %vm134_vm0, %v98_v15, 0.0 }
  0x3c   :  { %v221_v22 = vadd.f32 %v220_v19, %v219_v18 }
  0x3e   :  { %v223_v27 = vadd.f32 %v222_v23, %v221_v22 }
  0x40   :  { %v225_v32 = vadd.f32 %v224_v28, %v223_v27 }
  0x42   :  { %253 = vxpose.xlu0.b32.cont [7/16] (narrow) %v183_v26, 32  ;;  %v99_v26 = vld [vmem:[#allocation2 + $0x80] sm:$0xff] }
  0x43   :  { %v227_v30 = vsel %vm134_vm0, %v99_v26, 0.0 }
  0x44   :  { %v228_v33 = vadd.f32 %v227_v30, %v226_v29 }
  0x46   :  { %v230_v39 = vadd.f32 %v229_v34, %v228_v33 }
  0x48   :  { %v232_v44 = vadd.f32 %v231_v40, %v230_v39 }
  0x4a   :  { %254 = vxpose.xlu0.b32.cont [8/16] (narrow) %v190_v37, 32  ;;  %v100_v37 = vld [vmem:[#allocation2 + $0x140] sm:$0xff] }
  0x4b   :  { %v234_v42 = vsel %vm134_vm0, %v100_v37, 0.0 }
  0x4c   :  { %v235_v45 = vadd.f32 %v234_v42, %v233_v41 }
  0x4e   :  { %v237_v51 = vadd.f32 %v236_v46, %v235_v45 }
  0x50   :  { %v239_v56 = vadd.f32 %v238_v52, %v237_v51 }
  0x52   :  { %255 = vxpose.xlu0.b32.cont [9/16] (narrow) %v197_v49, 32  ;;  %v101_v49 = vld [vmem:[#allocation2 + $0x1d0] sm:$0xff] }
  0x53   :  { %v241_v54 = vsel %vm134_vm0, %v101_v49, 0.0 }
  0x54   :  { %v242_v57 = vadd.f32 %v241_v54, %v240_v53 }
  0x56   :  { %v244_v60 = vadd.f32 %v243_v58, %v242_v57  ;;  %v933_v58 = vld [vmem:[%s990_s2] sm:$0xff] }
  0x5a   :  { %256 = vxpose.xlu0.b32.cont [10/16] (narrow) %v204_v61, 32  ;;  %v245_v61 = vsel %vm134_vm0, %v133_v59, 0.0 }
  0x5b   :  { %v246_v63 = vadd.f32 %v245_v61, %v244_v60 }
  0x62   :  { %257 = vxpose.xlu0.b32.cont [11/16] (narrow) %v211_v9, 32 }
  0x6a   :  { %258 = vxpose.xlu0.b32.cont [12/16] (narrow) %v218_v21, 32 }
  0x72   :  { %259 = vxpose.xlu0.b32.cont [13/16] (narrow) %v225_v32, 32 }
  0x7a   :  { %260 = vxpose.xlu0.b32.cont [14/16] (narrow) %v232_v44, 32 }
  0x82   :  { %261 = vxpose.xlu0.b32.cont [15/16] (narrow) %v239_v56, 32 }
  0x86   :  { %v318_v0 = vpop.f32.mrf.mxu0 }
  0x8a   :  { %262 = vxpose.xlu0.b32.end [16/16] (narrow) %v246_v63, 32 }
  0x8e   :  { %v321_v2 = vpop.f32.mrf.mxu0 }
  0x96   :  { %v324_v4 = vpop.f32.mrf.mxu0 }
  0x9e   :  { %v327_v15 = vpop.f32.mrf.mxu0 }
  0xb6   :  { %v902_v1 = vpop.trf.xlu0 }
  0xb7   :  { %v914_v7 = vmul.f32 %v902_v1, %v902_v1 }
  0xb9   :  { %v330_v11 = vmul.f32 %v318_v0, %v914_v7 }
  0xbb   :  { %v334_v16 = vmul.f32 %v330_v11, %v318_v0 }
  0xbe   :  { %v904_v3 = vpop.trf.xlu0 }
  0xbf   :  { %v908_v5 = vmul.f32 %v904_v3, %v904_v3 }
  0xc1   :  { %v331_v9 = vmul.f32 %v321_v2, %v908_v5 }
  0xc3   :  { %v335_v13 = vmul.f32 %v331_v9, %v321_v2 }
  0xc5   :  { %v338_v19 = vadd.f32 %v335_v13, %v334_v16 }
  0xc6   :  { %v910_v6 = vpop.trf.xlu0 }
  0xc7   :  { %v918_v8 = vmul.f32 %v910_v6, %v910_v6 }
  0xc9   :  { %v332_v12 = vmul.f32 %v324_v4, %v918_v8 }
  0xcb   :  { %v336_v17 = vmul.f32 %v332_v12, %v324_v4 }
  0xcd   :  { %v339_v21 = vadd.f32 %v338_v19, %v336_v17 }
  0xce   :  { %v923_v14 = vpop.trf.xlu0 }
  0xcf   :  { %v927_v18 = vmul.f32 %v923_v14, %v923_v14 }
  0xd1   :  { %v333_v20 = vmul.f32 %v327_v15, %v927_v18 }
  0xd3   :  { %v337_v22 = vmul.f32 %v333_v20, %v327_v15 }
  0xd5   :  { %v340_v23 = vadd.f32 %v339_v21, %v337_v22 }
  0xd7   :  { %v341_v24 = vrot.slane %v340_v23, 4 }
  0xd9   :  { %v342_v25 = vadd.f32 %v341_v24, %v340_v23 }
  0xdb   :  { %v343_v26 = vrot.slane %v342_v25, 2 }
  0xdd   :  { %v344_v27 = vadd.f32 %v343_v26, %v342_v25 }
  0xdf   :  { %v345_v28 = vrot.slane %v344_v27, 1 }
  0xe1   :  { %v346_v29 = vadd.f32 %v345_v28, %v344_v27 }
  0xe3   :  { %728 = vrsqrt.f32 %v346_v29  ;;  %v359_v30 = vadd.f32 1.0, %v346_v29  ;;  %vm354_vm5 = vcmp.eq.f32.partialorder %v346_v29, inf  ;;  %v357_v46 = vand.u32 2147483648, %v346_v29 }
  0xe4   :  { %vm356_vm6 = vcmp.eq.f32.partialorder %v346_v29, 0.0 }
  0xe5   :  { %730 = vrcp.f32 %v359_v30  ;;  %v371_v41 = vand.u32 2147483648, %v359_v30  ;;  %v369_v43 = vand.u32 2147483647, %v359_v30  ;;  %vm365_vm3 = vweird.f32 %v359_v30 }
  0xe7   :  { %v372_v48 = vor.u32 1.1754944e-38, %v371_v41  ;;  %vm370_vm7 = vcmp.eq.f32.partialorder %v369_v43, 8.507059e+37 }
  0xe9   :  { %v729_v31 = vpop.eup %728 }
  0xea   :  { %v348_v32 = vmul.f32 %v729_v31, %v346_v29 }
  0xeb   :  { %v731_v33 = vpop.eup %730 }
  0xec   :  { %v349_v34 = vmul.f32 %v729_v31, %v348_v32  ;;  %v361_v35 = vmul.f32 %v731_v33, %v359_v30  ;;  %vm366_vm2 = vweird.f32 %v731_v33 }
  0xed   :  { %vm367_vm4 = vmor %vm365_vm3, %vm366_vm2 }
  0xee   :  { %v350_v36 = vmul.f32 0.5, %v349_v34  ;;  %v362_v37 = vsub.f32 1.0, %v361_v35 }
  0xf0   :  { %v351_v39 = vsub.f32 1.5, %v350_v36  ;;  %v363_v40 = vmul.f32 %v731_v33, %v362_v37 }
  0xf2   :  { %v352_v42 = vmul.f32 %v729_v31, %v351_v39  ;;  %v364_v44 = vadd.f32 %v731_v33, %v363_v40 }
  0xf4   :  { %v353_v45 = vmul.f32 %v352_v42, %v346_v29  ;;  %v368_v47 = vsel %vm367_vm4, %v731_v33, %v364_v44 }
  0xf5   :  { %v373_v52 = vsel %vm370_vm7, %v372_v48, %v368_v47 }
  0xf6   :  { %v355_v49 = vsel %vm354_vm5, %v346_v29, %v353_v45 }
  0xf7   :  { %v358_v51 = vsel %vm356_vm6, %v357_v46, %v355_v49 }
  0xf8   :  { %v374_v53 = vmul.f32 %v373_v52, %v358_v51 }
  0xfa   :  { %v378_v54 = vmul.f32 %v374_v53, %v333_v20  ;;  %v377_v55 = vmul.f32 %v374_v53, %v332_v12  ;;  %v376_v56 = vmul.f32 %v374_v53, %v331_v9  ;;  %v375_v57 = vmul.f32 %v374_v53, %v330_v11 }
  0xfc   :  { %394 = vmatpush.msra.mxu3 %v378_v54 }
  0xfe   :  { %395 = vmatpush.msra.mxu3 %v377_v55 }
 0x100   :  { %396 = vmatpush.msra.mxu3 %v376_v56 }
 0x102   :  { %397 = vmatpush.msra.mxu3 %v375_v57 }
 0x103   :  { %713 = vmatmul.msk.f32.vlgmr.msra.gmra.mxu3 %vm134_vm0, %v933_v58 }
 0x186   :  { %v937_v59 = vpop.f32.mrf.mxu3 }
 0x187   :  { %v402_v60 = vrot.slane %v937_v59, 4 }
 0x189   :  { %v403_v61 = vmax.f32 %v937_v59, %v402_v60 }
 0x18b   :  { %v404_v63 = vrot.slane %v403_v61, 2 }
 0x18d   :  { %v405_v0 = vmax.f32 %v403_v61, %v404_v63 }
 0x18f   :  { %v406_v2 = vrot.slane %v405_v0, 1 }
 0x191   :  { %v407_v4 = vmax.f32 %v405_v0, %v406_v2 }
 0x193   :  { %v408_v9 = vsub.f32 %v937_v59, %v407_v4 }
 0x195   :  { %v409_v11 = vmul.f32 1.442695, %v408_v9 }
 0x197   :  { %732 = vpow2.f32 %v409_v11 }
 0x19d   :  { %v733_v12 = vpop.eup %732 }
 0x19e   :  { %v411_v13 = vrot.slane %v733_v12, 4 }
 0x1a0   :  { %v412_v15 = vadd.f32 %v733_v12, %v411_v13 }
 0x1a2   :  { %v413_v16 = vrot.slane %v412_v15, 2 }
 0x1a4   :  { %v414_v17 = vadd.f32 %v413_v16, %v412_v15 }
 0x1a6   :  { %v415_v19 = vrot.slane %v414_v17, 1 }
 0x1a8   :  { %v416_v20 = vadd.f32 %v415_v19, %v414_v17 }
 0x1aa   :  { %734 = vrcp.f32 %v416_v20  ;;  %v428_v24 = vand.u32 2147483648, %v416_v20  ;;  %v426_v26 = vand.u32 2147483647, %v416_v20  ;;  %vm422_vm9 = vweird.f32 %v416_v20 }
 0x1ac   :  { %v429_v28 = vor.u32 1.1754944e-38, %v428_v24  ;;  %vm427_vm11 = vcmp.eq.f32.partialorder %v426_v26, 8.507059e+37 }
 0x1b0   :  { %v735_v21 = vpop.eup %734 }
 0x1b1   :  { %v418_v22 = vmul.f32 %v735_v21, %v416_v20  ;;  %vm423_vm8 = vweird.f32 %v735_v21 }
 0x1b2   :  { %vm424_vm10 = vmor %vm422_vm9, %vm423_vm8 }
 0x1b3   :  { %v419_v23 = vsub.f32 1.0, %v418_v22 }
 0x1b5   :  { %v420_v25 = vmul.f32 %v735_v21, %v419_v23 }
 0x1b7   :  { %v421_v27 = vadd.f32 %v735_v21, %v420_v25 }
 0x1b9   :  { %v425_v29 = vsel %vm424_vm10, %v735_v21, %v421_v27 }
 0x1ba   :  { %v430_v30 = vsel %vm427_vm11, %v429_v28, %v425_v29 }
 0x1bb   :  { %v431_v31 = vmul.f32 %v733_v12, %v430_v30 }
 0x1bd   :  { %447 = vmatpush.msra.mxu2 %v431_v31 }
 0x1be   :  { %714 = vmatmul.msk.f32.vlgmr.msra.gmra.mxu2 %vm288_vm1, %v824_v38 }
 0x1c6   :  { %715 = vmatmul.msk.f32.gmra.mxu2 %vm288_vm1, %v835_v50 }
 0x1ce   :  { %716 = vmatmul.msk.f32.gmra.mxu2 %vm288_vm1, %v846_v62 }
 0x1d6   :  { %717 = vmatmul.msk.f32.gmra.mxu2 %vm288_vm1, %v857_v10 }
 0x241   :  { %v449_v32 = vpop.f32.mrf.mxu2 }
 0x242   :  { %v461_v36 = vmul.f32 %v449_v32, %v914_v7 }
 0x244   :  { %v465_v40 = vmul.f32 %v461_v36, %v449_v32 }
 0x249   :  { %v452_v33 = vpop.f32.mrf.mxu2 }
 0x24a   :  { %v462_v35 = vmul.f32 %v452_v33, %v908_v5 }
 0x24c   :  { %v466_v39 = vmul.f32 %v462_v35, %v452_v33 }
 0x24e   :  { %v469_v43 = vadd.f32 %v466_v39, %v465_v40 }
 0x251   :  { %v455_v34 = vpop.f32.mrf.mxu2 }
 0x252   :  { %v463_v37 = vmul.f32 %v455_v34, %v918_v8 }
 0x254   :  { %v467_v41 = vmul.f32 %v463_v37, %v455_v34 }
 0x256   :  { %v470_v45 = vadd.f32 %v469_v43, %v467_v41 }
 0x259   :  { %v458_v42 = vpop.f32.mrf.mxu2 }
 0x25a   :  { %v464_v44 = vmul.f32 %v458_v42, %v927_v18 }
 0x25c   :  { %v468_v46 = vmul.f32 %v464_v44, %v458_v42 }
 0x25e   :  { %v471_v47 = vadd.f32 %v470_v45, %v468_v46 }
 0x260   :  { %v472_v48 = vrot.slane %v471_v47, 4 }
 0x262   :  { %v473_v49 = vadd.f32 %v472_v48, %v471_v47 }
 0x264   :  { %v474_v51 = vrot.slane %v473_v49, 2 }
 0x266   :  { %v475_v52 = vadd.f32 %v474_v51, %v473_v49 }
 0x268   :  { %v476_v53 = vrot.slane %v475_v52, 1 }
 0x26a   :  { %v477_v5 = vadd.f32 %v476_v53, %v475_v52 }
 0x26c   :  { %736 = vrsqrt.f32 %v477_v5  ;;  %v490_v7 = vadd.f32 1.0, %v477_v5  ;;  %vm485_vm15 = vcmp.eq.f32.partialorder %v477_v5, inf  ;;  %v488_v12 = vand.u32 2147483648, %v477_v5 }
 0x26d   :  { %vm487_vm2 = vcmp.eq.f32.partialorder %v477_v5, 0.0 }
 0x26e   :  { %738 = vrcp.f32 %v490_v7  ;;  %v502_v0 = vand.u32 2147483648, %v490_v7  ;;  %v500_v4 = vand.u32 2147483647, %v490_v7  ;;  %vm496_vm13 = vweird.f32 %v490_v7 }
 0x270   :  { %v503_v15 = vor.u32 1.1754944e-38, %v502_v0  ;;  %vm501_vm3 = vcmp.eq.f32.partialorder %v500_v4, 8.507059e+37 }
 0x272   :  { %v737_v8 = vpop.eup %736 }
 0x273   :  { %v479_v54 = vmul.f32 %v737_v8, %v477_v5 }
 0x274   :  { %v739_v55 = vpop.eup %738 }
 0x275   :  { %v480_v56 = vmul.f32 %v737_v8, %v479_v54  ;;  %v492_v57 = vmul.f32 %v739_v55, %v490_v7  ;;  %vm497_vm12 = vweird.f32 %v739_v55 }
 0x276   :  { %vm498_vm14 = vmor %vm496_vm13, %vm497_vm12 }
 0x277   :  { %v481_v60 = vmul.f32 0.5, %v480_v56  ;;  %v493_v61 = vsub.f32 1.0, %v492_v57 }
 0x279   :  { %v482_v18 = vsub.f32 1.5, %v481_v60  ;;  %v494_v63 = vmul.f32 %v739_v55, %v493_v61 }
 0x27b   :  { %v483_v2 = vmul.f32 %v737_v8, %v482_v18  ;;  %v495_v9 = vadd.f32 %v739_v55, %v494_v63 }
 0x27d   :  { %v484_v11 = vmul.f32 %v483_v2, %v477_v5  ;;  %v499_v13 = vsel %vm498_vm14, %v739_v55, %v495_v9 }
 0x27e   :  { %v504_v19 = vsel %vm501_vm3, %v503_v15, %v499_v13 }
 0x27f   :  { %v486_v16 = vsel %vm485_vm15, %v477_v5, %v484_v11 }
 0x280   :  { %v489_v17 = vsel %vm487_vm2, %v488_v12, %v486_v16 }
 0x281   :  { %v505_v20 = vmul.f32 %v504_v19, %v489_v17 }
 0x283   :  { %v509_v21 = vmul.f32 %v505_v20, %v464_v44  ;;  %v508_v22 = vmul.f32 %v505_v20, %v463_v37  ;;  %v507_v23 = vmul.f32 %v505_v20, %v462_v35  ;;  %v506_v24 = vmul.f32 %v505_v20, %v461_v36 }
 0x285   :  { %522 = vmatpush.msrb.mxu3 %v509_v21 }
 0x287   :  { %523 = vmatpush.msrb.mxu3 %v508_v22 }
 0x289   :  { %524 = vmatpush.msrb.mxu3 %v507_v23 }
 0x28b   :  { %525 = vmatpush.msrb.mxu3 %v506_v24 }
 0x28c   :  { %718 = vmatmul.msk.f32.vlgmr.msrb.gmra.mxu3 %vm134_vm0, %v933_v58 }
 0x30f   :  { %v527_v25 = vpop.f32.mrf.mxu3 }
 0x310   :  { %v530_v26 = vadd.f32 %v527_v25, %v937_v59 }
 0x312   :  { %v531_v27 = vrot.slane %v530_v26, 4 }
 0x314   :  { %v532_v28 = vmax.f32 %v530_v26, %v531_v27 }
 0x316   :  { %v533_v29 = vrot.slane %v532_v28, 2 }
 0x318   :  { %v534_v30 = vmax.f32 %v532_v28, %v533_v29 }
 0x31a   :  { %v535_v31 = vrot.slane %v534_v30, 1 }
 0x31c   :  { %v536_v32 = vmax.f32 %v534_v30, %v535_v31 }
 0x31e   :  { %v537_v33 = vsub.f32 %v530_v26, %v536_v32 }
 0x320   :  { %v538_v34 = vmul.f32 1.442695, %v537_v33 }
 0x322   :  { %740 = vpow2.f32 %v538_v34 }
 0x328   :  { %v741_v37 = vpop.eup %740 }
 0x329   :  { %v540_v35 = vrot.slane %v741_v37, 4 }
 0x32b   :  { %v541_v39 = vadd.f32 %v741_v37, %v540_v35 }
 0x32d   :  { %v542_v36 = vrot.slane %v541_v39, 2 }
 0x32f   :  { %v543_v40 = vadd.f32 %v542_v36, %v541_v39 }
 0x331   :  { %v544_v41 = vrot.slane %v543_v40, 1 }
 0x333   :  { %v545_v42 = vadd.f32 %v544_v41, %v543_v40 }
 0x335   :  { %742 = vrcp.f32 %v545_v42  ;;  %v557_v44 = vand.u32 2147483648, %v545_v42  ;;  %v555_v46 = vand.u32 2147483647, %v545_v42  ;;  %vm551_vm5 = vweird.f32 %v545_v42 }
 0x337   :  { %v558_v48 = vor.u32 1.1754944e-38, %v557_v44  ;;  %vm556_vm7 = vcmp.eq.f32.partialorder %v555_v46, 8.507059e+37 }
 0x33b   :  { %v743_v58 = vpop.eup %742 }
 0x33c   :  { %v547_v43 = vmul.f32 %v743_v58, %v545_v42  ;;  %vm552_vm4 = vweird.f32 %v743_v58 }
 0x33d   :  { %vm553_vm6 = vmor %vm551_vm5, %vm552_vm4 }
 0x33e   :  { %v548_v59 = vsub.f32 1.0, %v547_v43 }
 0x340   :  { %v549_v45 = vmul.f32 %v743_v58, %v548_v59 }
 0x342   :  { %v550_v47 = vadd.f32 %v743_v58, %v549_v45 }
 0x344   :  { %v554_v49 = vsel %vm553_vm6, %v743_v58, %v550_v47 }
 0x345   :  { %v559_v51 = vsel %vm556_vm7, %v558_v48, %v554_v49 }
 0x346   :  { %v560_v52 = vmul.f32 %v741_v37, %v559_v51 }
 0x348   :  { %576 = vmatpush.msra.mxu1 %v560_v52 }
 0x349   :  { %719 = vmatmul.msk.f32.vlgmr.msra.gmra.mxu1 %vm288_vm1, %v824_v38 }
 0x351   :  { %720 = vmatmul.msk.f32.gmra.mxu1 %vm288_vm1, %v835_v50 }
 0x359   :  { %721 = vmatmul.msk.f32.gmra.mxu1 %vm288_vm1, %v846_v62 }
 0x361   :  { %722 = vmatmul.msk.f32.gmra.mxu1 %vm288_vm1, %v857_v10 }
 0x3c6   :  { %v578_v53 = vpop.f32.mrf.mxu1 }
 0x3c7   :  { %v590_v54 = vmul.f32 %v578_v53, %v902_v1 }
 0x3c9   :  { %v594_v38 = vmul.f32 %v590_v54, %v590_v54 }
 0x3ce   :  { %v581_v5 = vpop.f32.mrf.mxu1 }
 0x3cf   :  { %v591_v8 = vmul.f32 %v581_v5, %v904_v3 }
 0x3d1   :  { %v595_v56 = vmul.f32 %v591_v8, %v591_v8 }
 0x3d3   :  { %v598_v50 = vadd.f32 %v595_v56, %v594_v38 }
 0x3d6   :  { %v584_v7 = vpop.f32.mrf.mxu1 }
 0x3d7   :  { %v592_v55 = vmul.f32 %v584_v7, %v910_v6 }
 0x3d9   :  { %v596_v57 = vmul.f32 %v592_v55, %v592_v55 }
 0x3db   :  { %v599_v62 = vadd.f32 %v598_v50, %v596_v57 }
 0x3de   :  { %v587_v60 = vpop.f32.mrf.mxu1 }
 0x3df   :  { %v593_v61 = vmul.f32 %v587_v60, %v923_v14 }
 0x3e1   :  { %v597_v18 = vmul.f32 %v593_v61, %v593_v61 }
 0x3e3   :  { %v600_v63 = vadd.f32 %v599_v62, %v597_v18 }
 0x3e5   :  { %v601_v10 = vrot.slane %v600_v63, 4 }
 0x3e7   :  { %v602_v0 = vadd.f32 %v601_v10, %v600_v63 }
 0x3e9   :  { %v603_v2 = vrot.slane %v602_v0, 2 }
 0x3eb   :  { %v604_v4 = vadd.f32 %v603_v2, %v602_v0 }
 0x3ed   :  { %v605_v9 = vrot.slane %v604_v4, 1 }
 0x3ef   :  { %v606_v3 = vadd.f32 %v605_v9, %v604_v4 }
 0x3f1   :  { %744 = vrsqrt.f32 %v606_v3  ;;  %v619_v1 = vadd.f32 1.0, %v606_v3  ;;  %vm614_vm10 = vcmp.eq.f32.partialorder %v606_v3, inf  ;;  %v617_v25 = vand.u32 2147483648, %v606_v3 }
 0x3f2   :  { %vm616_vm11 = vcmp.eq.f32.partialorder %v606_v3, 0.0 }
 0x3f3   :  { %746 = vrcp.f32 %v619_v1  ;;  %v631_v20 = vand.u32 2147483648, %v619_v1  ;;  %v629_v22 = vand.u32 2147483647, %v619_v1  ;;  %vm625_vm8 = vweird.f32 %v619_v1 }
 0x3f5   :  { %v632_v27 = vor.u32 1.1754944e-38, %v631_v20  ;;  %vm630_vm12 = vcmp.eq.f32.partialorder %v629_v22, 8.507059e+37 }
 0x3f7   :  { %v745_v6 = vpop.eup %744 }
 0x3f8   :  { %v608_v11 = vmul.f32 %v745_v6, %v606_v3 }
 0x3f9   :  { %v747_v12 = vpop.eup %746 }
 0x3fa   :  { %v609_v13 = vmul.f32 %v745_v6, %v608_v11  ;;  %v621_v15 = vmul.f32 %v747_v12, %v619_v1  ;;  %vm626_vm1 = vweird.f32 %v747_v12 }
 0x3fb   :  { %vm627_vm9 = vmor %vm625_vm8, %vm626_vm1 }
 0x3fc   :  { %v610_v16 = vmul.f32 0.5, %v609_v13  ;;  %v622_v17 = vsub.f32 1.0, %v621_v15 }
 0x3fe   :  { %v611_v14 = vsub.f32 1.5, %v610_v16  ;;  %v623_v19 = vmul.f32 %v747_v12, %v622_v17 }
 0x400   :  { %v612_v21 = vmul.f32 %v745_v6, %v611_v14  ;;  %v624_v23 = vadd.f32 %v747_v12, %v623_v19 }
 0x402   :  { %v613_v24 = vmul.f32 %v612_v21, %v606_v3  ;;  %v628_v26 = vsel %vm627_vm9, %v747_v12, %v624_v23 }
 0x403   :  { %v633_v30 = vsel %vm630_vm12, %v632_v27, %v628_v26 }
 0x404   :  { %v615_v28 = vsel %vm614_vm10, %v606_v3, %v613_v24 }
 0x405   :  { %v618_v29 = vsel %vm616_vm11, %v617_v25, %v615_v28 }
 0x406   :  { %v634_v31 = vmul.f32 %v633_v30, %v618_v29 }
 0x408   :  { %v635_v32 = vmul.f32 %v634_v31, %v590_v54  ;;  %v636_v33 = vmul.f32 %v634_v31, %v591_v8  ;;  %v637_v34 = vmul.f32 %v634_v31, %v592_v55  ;;  %v638_v37 = vmul.f32 %v634_v31, %v593_v61 }
 0x40a   :  { %639 = vxpose.xlu1.b32.start [1/4] (short) %v635_v32, 128 }
 0x412   :  { %640 = vxpose.xlu1.b32.cont [2/4] (short) %v636_v33, 128 }
 0x41a   :  { %641 = vxpose.xlu1.b32.cont [3/4] (short) %v637_v34, 128 }
 0x422   :  { %642 = vxpose.xlu1.b32.end [4/4] (short) %v638_v37, 128 }
 0x4ae   :  { %v655_v35 = vpop.trf.xlu1 }
 0x4af   :  { %671 = vst.msk [vmem:[#allocation3] sm:$0xff] %vm134_vm0, %v655_v35 }
 0x4b6   :  { %v656_v39 = vpop.trf.xlu1 }
 0x4b7   :  { %672 = vst.msk [vmem:[#allocation3 + $0x8] sm:$0xff] %vm134_vm0, %v656_v39 }
 0x4be   :  { %v657_v36 = vpop.trf.xlu1 }
 0x4bf   :  { %673 = vst.msk [vmem:[#allocation3 + $0x10] sm:$0xff] %vm134_vm0, %v657_v36 }
 0x4c6   :  { %v658_v40 = vpop.trf.xlu1 }
 0x4c7   :  { %674 = vst.msk [vmem:[#allocation3 + $0x18] sm:$0xff] %vm134_vm0, %v658_v40 }
 0x4ce   :  { %v659_v41 = vpop.trf.xlu1 }
 0x4cf   :  { %675 = vst.msk [vmem:[#allocation3 + $0x20] sm:$0xff] %vm134_vm0, %v659_v41 }
 0x4d6   :  { %v660_v42 = vpop.trf.xlu1 }
 0x4d7   :  { %676 = vst.msk [vmem:[#allocation3 + $0x28] sm:$0xff] %vm134_vm0, %v660_v42 }
 0x4de   :  { %v661_v58 = vpop.trf.xlu1 }
 0x4df   :  { %677 = vst.msk [vmem:[#allocation3 + $0x30] sm:$0xff] %vm134_vm0, %v661_v58 }
 0x4e6   :  { %v662_v43 = vpop.trf.xlu1 }
 0x4e7   :  { %678 = vst.msk [vmem:[#allocation3 + $0x38] sm:$0xff] %vm134_vm0, %v662_v43 }
 0x4ee   :  { %v663_v59 = vpop.trf.xlu1 }
 0x4ef   :  { %679 = vst.msk [vmem:[#allocation3 + $0x40] sm:$0xff] %vm134_vm0, %v663_v59 }
 0x4f6   :  { %v664_v44 = vpop.trf.xlu1 }
 0x4f7   :  { %680 = vst.msk [vmem:[#allocation3 + $0x48] sm:$0xff] %vm134_vm0, %v664_v44 }
 0x4fe   :  { %v665_v45 = vpop.trf.xlu1 }
 0x4ff   :  { %681 = vst.msk [vmem:[#allocation3 + $0x50] sm:$0xff] %vm134_vm0, %v665_v45 }
 0x506   :  { %v666_v46 = vpop.trf.xlu1 }
 0x507   :  { %682 = vst.msk [vmem:[#allocation3 + $0x58] sm:$0xff] %vm134_vm0, %v666_v46 }
 0x50e   :  { %v667_v47 = vpop.trf.xlu1 }
 0x50f   :  { %683 = vst.msk [vmem:[#allocation3 + $0x60] sm:$0xff] %vm134_vm0, %v667_v47 }
 0x516   :  { %v668_v48 = vpop.trf.xlu1 }
 0x517   :  { %684 = vst.msk [vmem:[#allocation3 + $0x68] sm:$0xff] %vm134_vm0, %v668_v48 }
 0x51e   :  { %v669_v49 = vpop.trf.xlu1 }
 0x51f   :  { %685 = vst.msk [vmem:[#allocation3 + $0x70] sm:$0xff] %vm134_vm0, %v669_v49 }
 0x526   :  { %v670_v51 = vpop.trf.xlu1 }
 0x527   :  { %686 = vst.msk [vmem:[#allocation3 + $0x78] sm:$0xff] %vm134_vm0, %v670_v51 }
 0x528   :  { %690 = vsyncadd [#allocation4], 2016  ;;  %s693_s29 = sshll.u32 %s991_s3, 4  ;;  %s775_s30 = smov [#allocation3]   ;;  %s694_s29 = int_to_ptr.hbm [resolvable:$true] %s693_s29 }
 0x529   :  { %s691_s4 = sshll.u32 %s775_s30, 4  ;;  %s776_s5 = smov 32   ;;  %s692_s4 = int_to_ptr.vmem [resolvable:$true] %s691_s4 }
 0x52a   :  { %s777_s6 = smov 2  }
 0x52b   :  { %699 = dma.vmem_to_hbm [thread:$0]  %s692_s4, 32, %s694_s29, [#allocation4], %s776_s5, %s776_s5, %s777_s6  }
 0x52c   :  { %772 = dma.done.wait [#allocation4], 2048  }
 0x52d   :  { %773 = vsyncadd [#allocation4], 4294965248 }
 0x52e   :  { %704 = vsyncpa [#allocation4], 1 }

</bundles_post_ra>
